<compile_context>
chip_gen: v6e
topology: v6e:2x2x1
jax: 0.10.0
libtpu: 0.0.40
codegen_flags: <defaults>
</compile_context>

<pallas_src>
import jax
import jax.numpy as jnp
from jax.experimental import pallas as pl
from jax.experimental.pallas import tpu as pltpu

LANES = 128
# ~4 MiB per block per array: big enough for >=85% of the HBM roofline on
# elementwise kernels, small enough that in+out double-buffering (16 MiB total)
# fits every generation's VMEM budget with the 32 MiB scoped limit below.
_TARGET_BLOCK_BYTES = 4 * 1024 * 1024
_VMEM_LIMIT_BYTES = 32 * 1024 * 1024


def _clamp_kernel(x_ref, o_ref):
    # Pure VPU elementwise clamp to [0, 1].
    x = x_ref[...]
    zero = jnp.zeros((), dtype=x.dtype)
    one = jnp.ones((), dtype=x.dtype)
    o_ref[...] = jnp.minimum(jnp.maximum(x, zero), one)


def clamp01(x: jax.Array, *, donate: bool = False) -> jax.Array:
    """Clamp any-shaped array to [0, 1] via a Pallas TPU kernel."""
    orig_shape = x.shape
    dtype = x.dtype
    itemsize = jnp.dtype(dtype).itemsize

    flat = x.reshape(-1)
    n = flat.shape[0]
    if n == 0:
        # Nothing to do; avoid a zero-sized grid launch.
        return x

    # Native sublane tile is dtype dependent (sub-32-bit packs along sublanes).
    packing = max(1, 4 // itemsize)
    sublanes = 8 * packing

    # Pad only up to the next multiple of 128 lanes (needed for the 2D view).
    # Aligned inputs (n % 128 == 0) take the zero-copy path: no pad, no slice.
    padded_n = ((n + LANES - 1) // LANES) * LANES
    needs_pad = padded_n != n
    if needs_pad:
        flat = jnp.pad(flat, (0, padded_n - n))
    rows = padded_n // LANES
    x2d = flat.reshape(rows, LANES)

    # Block rows: ~_TARGET_BLOCK_BYTES per block, a multiple of the native
    # sublane tile. The last (ragged) block is masked by the Pallas pipeline,
    # so the grid is simply cdiv(rows, tr) -- no tile shrinking for awkward
    # row counts.
    tile_rows = _TARGET_BLOCK_BYTES // (LANES * itemsize)
    tile_rows = max(sublanes, (tile_rows // sublanes) * sublanes)
    rows_rounded = ((rows + sublanes - 1) // sublanes) * sublanes
    tr = min(tile_rows, rows_rounded)
    grid = (pl.cdiv(rows, tr),)

    out2d = pl.pallas_call(
        _clamp_kernel,
        out_shape=jax.ShapeDtypeStruct((rows, LANES), dtype),
        grid_spec=pltpu.PrefetchScalarGridSpec(
            num_scalar_prefetch=0,
            grid=grid,
            in_specs=[pl.BlockSpec((tr, LANES), lambda i: (i, 0))],
            out_specs=pl.BlockSpec((tr, LANES), lambda i: (i, 0)),
        ),
        compiler_params=pltpu.CompilerParams(
            dimension_semantics=("parallel",),
            vmem_limit_bytes=_VMEM_LIMIT_BYTES,
        ),
        input_output_aliases=({0: 0} if donate else {}),
    )(x2d)

    if needs_pad:
        return out2d.reshape(-1)[:n].reshape(orig_shape)
    return out2d.reshape(orig_shape)


if __name__ == "__main__":
    key = jax.random.PRNGKey(0)
    clamp = jax.jit(clamp01)

    # NCHW input (conv convention), values outside [0, 1] so the clamp matters.
    x = jax.random.normal(key, (2, 4, 16, 16), dtype=jnp.float32) * 3.0
    y = clamp(x)
    jax.block_until_ready(y)
    y_ref = jnp.clip(x, 0.0, 1.0)
    assert y.shape == x.shape and y.dtype == x.dtype
    assert jnp.allclose(y, y_ref), "mismatch vs reference clamp (aligned path)"

    # Unaligned element count exercises the pad + ragged-boundary path.
    x_odd = jax.random.normal(jax.random.PRNGKey(1), (3, 5, 7, 11),
                              dtype=jnp.float32) * 3.0
    y_odd = clamp(x_odd)
    jax.block_until_ready(y_odd)
    assert y_odd.shape == x_odd.shape and y_odd.dtype == x_odd.dtype
    assert jnp.allclose(y_odd, jnp.clip(x_odd, 0.0, 1.0)), \
        "mismatch vs reference clamp (ragged path)"

    # bf16 exercises the packed-dtype (16-sublane) tiling path.
    x_bf16 = (jax.random.normal(jax.random.PRNGKey(2), (2, 4, 16, 16),
                                dtype=jnp.float32) * 3.0).astype(jnp.bfloat16)
    y_bf16 = clamp(x_bf16)
    jax.block_until_ready(y_bf16)
    assert y_bf16.dtype == jnp.bfloat16
    assert jnp.allclose(y_bf16.astype(jnp.float32),
                        jnp.clip(x_bf16.astype(jnp.float32), 0.0, 1.0)), \
        "mismatch vs reference clamp (bf16 path)"

    print("KERNEL_OK")
</pallas_src>

<mosaic_0001>
module attributes {stable_mosaic.version = 11 : i64} {
  func.func @_clamp_kernel(%arg0: i32, %arg1: memref<16x128xf32, #tpu.memory_space<vmem>>, %arg2: memref<16x128xf32, #tpu.memory_space<vmem>>) attributes {dimension_semantics = [#tpu.dimension_semantics<parallel>], iteration_bounds = array<i64: 1>, scalar_prefetch = 0 : i64, scratch_operands = 0 : i64, tpu.core_type = #tpu.core_type<tc>, window_params = [{transform_indices = @transform_0, window_bounds = array<i64: 16, 128>}, {transform_indices = @transform_1, window_bounds = array<i64: 16, 128>}]} {
    %c0 = arith.constant 0 : index
    %c0_0 = arith.constant 0 : index
    %0 = vector.load %arg1[%c0, %c0_0] : memref<16x128xf32, #tpu.memory_space<vmem>>, vector<16x128xf32>
    %cst = arith.constant 0.000000e+00 : f32
    %1 = vector.broadcast %cst : f32 to vector<16x128xf32>
    %2 = arith.maximumf %0, %1 : vector<16x128xf32>
    %cst_1 = arith.constant 1.000000e+00 : f32
    %3 = vector.broadcast %cst_1 : f32 to vector<16x128xf32>
    %4 = arith.minimumf %2, %3 : vector<16x128xf32>
    %c0_2 = arith.constant 0 : index
    %c0_3 = arith.constant 0 : index
    %5 = vector.load %arg2[%c0_2, %c0_3] : memref<16x128xf32, #tpu.memory_space<vmem>>, vector<16x128xf32>
    tpu.vector_store %arg2[%c0_2, %c0_3], %4 {strides = array<i32>} : memref<16x128xf32, #tpu.memory_space<vmem>>, vector<16x128xf32>,
    return
  }
  func.func @transform_0(%arg0: i32) -> (i32, i32) {
    %c0_i32 = arith.constant 0 : i32
    %c0_i32_0 = arith.constant 0 : i32
    return %arg0, %c0_i32 : i32, i32
  }
  func.func @transform_1(%arg0: i32) -> (i32, i32) {
    %c0_i32 = arith.constant 0 : i32
    %c0_i32_0 = arith.constant 0 : i32
    return %arg0, %c0_i32 : i32, i32
  }
}

</mosaic_0001>

<bundles_post_ra>
// kernel: clamp01.1
= control target key start
LH: loop header
LB: loop body
LE: loop exit
PB: predicated region body
PF: predicated region fallthrough
CT: control target
= control target key end

     0   :  { %s42_s0 = inlined_call_operand.vmem [shape: f32[16,128], index: 0, kind: input, shape index: {}]   ;;  %s43_s1 = inlined_call_operand.vmem [shape: f32[16,128], index: 1, kind: output, shape index: {}]  }
   0x1   :  { %v8_v0 = vld [vmem:[%s42_s0] sm:$0xff]  ;;  %v9_v1 = vld [vmem:[%s42_s0 + $0x8] sm:$0xff] }
   0x2   :  { %v10_v2 = vmax.f32 %v8_v0, 0.0  ;;  %v11_v3 = vmax.f32 %v9_v1, 0.0 }
   0x4   :  { %v12_v4 = vmin.f32 %v10_v2, 1.0  ;;  %v13_v5 = vmin.f32 %v11_v3, 1.0 }
   0x6   :  { %14 = vst [vmem:[%s43_s1] sm:$0xff] %v12_v4  ;;  %15 = vst [vmem:[%s43_s1 + $0x8] sm:$0xff] %v13_v5 }

</bundles_post_ra>
